<compile_context>
chip_gen: v5e
topology: v5e:2x2
jax: 0.10.0
libtpu: 0.0.40
codegen_flags: <defaults>
</compile_context>

<pallas_src>
import math

import jax
import jax.numpy as jnp
from jax.experimental import pallas as pl
from jax.experimental.pallas import tpu as pltpu

_TILE_BYTES = 4 * 1024 * 1024          # per-step block size (per array)
_VMEM_LIMIT_BYTES = 32 * 1024 * 1024   # explicit scoped-VMEM limit (all chips OK)
_LANE_WIDTHS = (4096, 2048, 1024, 512, 256, 128)   # lane-dense candidate widths
_MIN_GRID = 4                           # feed both v7x TCs + keep pipeline deep


def _round_up(x, n):
    return ((x + n - 1) // n) * n


def _round_down(x, n):
    return (x // n) * n


def _rgb_kernel(x_ref, o_ref):
    # Pure VPU elementwise affine on one lane-dense tile.  Weak-typed Python
    # constants keep the compute in the input dtype (no bf16 upcast).
    o_ref[...] = x_ref[...] * 0.5 + 0.5


@jax.jit
def rgb_processor_forward(images: jax.Array) -> jax.Array:
    """Pallas TPU implementation of RGBProcessor.forward (images * 0.5 + 0.5)."""
    shape = images.shape
    dtype = images.dtype
    total = math.prod(shape)
    itemsize = jnp.dtype(dtype).itemsize

    # Lane-dense 2D view: pick the largest width (multiple of 128) dividing the
    # element count so stores are full-width `vst` and no pad/slice copies occur.
    lane_w = next((w for w in _LANE_WIDTHS if total > 0 and total % w == 0), None)
    if lane_w is None:
        # Element count not a multiple of 128 (e.g. 3*518*518 images): a fused
        # XLA elementwise op is already at the 1R+1W HBM roofline; the old
        # pad/slice path around the kernel cost ~3x the traffic.
        return images * 0.5 + 0.5

    m = total // lane_w
    x2d = images.reshape(m, lane_w)

    # Tile sizing in bytes (dtype-independent DMA granularity / step overhead).
    tile_rows = max(8, _round_down((_TILE_BYTES // itemsize) // lane_w, 8))

    if m <= 8:
        block_rows = m                   # single block == full array dims (legal)
    else:
        n_blocks = pl.cdiv(m, tile_rows)
        # Ensure enough (and an even number of) blocks so both v7x TensorCores
        # get balanced work and the auto-pipeline has >= 2 steps in flight.
        n_blocks = max(n_blocks, _MIN_GRID)
        if n_blocks % 2:
            n_blocks += 1
        block_rows = max(8, _round_up(pl.cdiv(m, n_blocks), 8))

    grid = (pl.cdiv(m, block_rows),)     # boundary block masked by Pallas

    out2d = pl.pallas_call(
        _rgb_kernel,
        out_shape=jax.ShapeDtypeStruct((m, lane_w), dtype),
        grid=grid,
        in_specs=[pl.BlockSpec((block_rows, lane_w), lambda i: (i, 0))],
        out_specs=pl.BlockSpec((block_rows, lane_w), lambda i: (i, 0)),
        compiler_params=pltpu.CompilerParams(
            dimension_semantics=("parallel",),
            vmem_limit_bytes=_VMEM_LIMIT_BYTES,
        ),
        cost_estimate=pl.CostEstimate(
            flops=2 * total,
            transcendentals=0,
            bytes_accessed=2 * total * itemsize,
        ),
    )(x2d)

    return out2d.reshape(shape)


if __name__ == "__main__":
    key = jax.random.PRNGKey(0)
    # RGB images, NCHW, channels = 3 (matches the module), values in [-1, 1].
    x = jax.random.uniform(
        key, (2, 3, 16, 16), dtype=jnp.float32, minval=-1.0, maxval=1.0
    )

    out = jax.block_until_ready(rgb_processor_forward(x))

    # Sanity check against the reference semantics.
    ref = x * 0.5 + 0.5
    assert out.shape == x.shape and out.dtype == x.dtype
    assert jnp.allclose(out, ref, atol=1e-6, rtol=1e-6)

    print("KERNEL_OK")
</pallas_src>

<mosaic_0001>
module attributes {stable_mosaic.version = 11 : i64} {
  func.func @_rgb_kernel(%arg0: i32, %arg1: memref<3x512xf32, #tpu.memory_space<vmem>>, %arg2: memref<3x512xf32, #tpu.memory_space<vmem>>) attributes {dimension_semantics = [#tpu.dimension_semantics<parallel>], iteration_bounds = array<i64: 1>, scalar_prefetch = 0 : i64, scratch_operands = 0 : i64, tpu.core_type = #tpu.core_type<tc>, window_params = [{transform_indices = @transform_0, window_bounds = array<i64: 3, 512>}, {transform_indices = @transform_1, window_bounds = array<i64: 3, 512>}]} {
    %c0 = arith.constant 0 : index
    %c0_0 = arith.constant 0 : index
    %0 = vector.load %arg1[%c0, %c0_0] : memref<3x512xf32, #tpu.memory_space<vmem>>, vector<3x512xf32>
    %cst = arith.constant 5.000000e-01 : f32
    %1 = vector.broadcast %cst : f32 to vector<3x512xf32>
    %2 = arith.mulf %0, %1 : vector<3x512xf32>
    %cst_1 = arith.constant 5.000000e-01 : f32
    %3 = vector.broadcast %cst_1 : f32 to vector<3x512xf32>
    %4 = arith.addf %2, %3 : vector<3x512xf32>
    %c0_2 = arith.constant 0 : index
    %c0_3 = arith.constant 0 : index
    %5 = vector.load %arg2[%c0_2, %c0_3] : memref<3x512xf32, #tpu.memory_space<vmem>>, vector<3x512xf32>
    tpu.vector_store %arg2[%c0_2, %c0_3], %4 {strides = array<i32>} : memref<3x512xf32, #tpu.memory_space<vmem>>, vector<3x512xf32>,
    return
  }
  func.func @transform_0(%arg0: i32) -> (i32, i32) {
    %c0_i32 = arith.constant 0 : i32
    %c0_i32_0 = arith.constant 0 : i32
    return %arg0, %c0_i32 : i32, i32
  }
  func.func @transform_1(%arg0: i32) -> (i32, i32) {
    %c0_i32 = arith.constant 0 : i32
    %c0_i32_0 = arith.constant 0 : i32
    return %arg0, %c0_i32 : i32, i32
  }
}

</mosaic_0001>

<bundles_post_ra>
// kernel: rgb_processor_forward.1
= control target key start
LH: loop header
LB: loop body
LE: loop exit
PB: predicated region body
PF: predicated region fallthrough
CT: control target
= control target key end

     0   :  { %s42_s0 = inlined_call_operand.vmem [shape: f32[3,512], index: 0, kind: input, shape index: {}]   ;;  %s43_s1 = inlined_call_operand.vmem [shape: f32[3,512], index: 1, kind: output, shape index: {}]  }
   0x1   :  { %v8_v0 = vld [vmem:[%s42_s0] sm:$0x77]  ;;  %v9_v1 = vld [vmem:[%s42_s0 + $0x8] sm:$0x77] }
   0x2   :  { %v10_v2 = vmul.f32 0.5, %v8_v0  ;;  %v11_v3 = vmul.f32 0.5, %v9_v1 }
   0x4   :  { %v12_v4 = vadd.f32 0.5, %v10_v2  ;;  %v13_v5 = vadd.f32 0.5, %v11_v3 }
   0x6   :  { %14 = vst [vmem:[%s43_s1] sm:$0x77] %v12_v4 }
   0x7   :  { %15 = vst [vmem:[%s43_s1 + $0x8] sm:$0x77] %v13_v5 }

</bundles_post_ra>
